<compile_context>
chip_gen: v7x
topology: tpu7x:2x2x1
jax: 0.10.0
libtpu: 0.0.40
codegen_flags: <defaults>
</compile_context>

<pallas_src>
import functools

import jax
import jax.numpy as jnp
from jax.experimental import pallas as pl
from jax.experimental.pallas import tpu as pltpu


def _round_up(x, m):
    return ((x + m - 1) // m) * m


# ---------------------------------------------------------------------------
# Kernel 1: projection  h = x @ W ; f1 = sum(h*a1, -1) ; f2 = sum(h*a2, -1)
# ---------------------------------------------------------------------------
def _gat_project_kernel(x_ref, w_ref, a1_ref, a2_ref, h_ref, f1_ref, f2_ref):
    # f1/f2 (the attention-logit halves) are always computed from the f32 h so
    # the softmax logits stay exact even when h is stored in bf16 for the MXU.
    h = jnp.dot(x_ref[...], w_ref[...], preferred_element_type=jnp.float32)
    # a1/a2 arrive lane-dense as [1, F_out_pad]; these tiny projections run on
    # the VPU (multiply + row reduce) instead of width-1 MXU matmuls.
    f1_ref[...] = jnp.sum(h * a1_ref[...], axis=-1, keepdims=True)
    f2_ref[...] = jnp.sum(h * a2_ref[...], axis=-1, keepdims=True)
    h_ref[...] = h.astype(h_ref.dtype)


# ---------------------------------------------------------------------------
# Kernel 2: online-softmax attention + aggregation (+ optional ELU)
# ---------------------------------------------------------------------------
def _gat_attention_kernel(f1_ref, f2_ref, adj_ref, h_ref, out_ref,
                          m_sc, l_sc, acc_sc, *, alpha, concat, tk, h_resident):
    j = pl.program_id(1)

    @pl.when(j == 0)
    def _():
        m_sc[...] = jnp.full(m_sc.shape, -jnp.inf, m_sc.dtype)
        l_sc[...] = jnp.zeros(l_sc.shape, l_sc.dtype)
        acc_sc[...] = jnp.zeros(acc_sc.shape, acc_sc.dtype)

    # e[i, k] = LeakyReLU(f1[i] + f2[k]); non-edges masked with -9e15 (as torch).
    e = f1_ref[...] + f2_ref[...]                        # [tq, 1] + [1, tk]
    e = jnp.where(e > 0, e, alpha * e)                   # LeakyReLU(alpha)
    e = jnp.where(adj_ref[...] > 0, e, -9e15)            # int8 adjacency mask

    # Online softmax update (statistics always f32, also on v5e).
    m_prev = m_sc[...]
    m_new = jnp.maximum(m_prev, jnp.max(e, axis=1, keepdims=True))
    corr = jnp.exp(m_prev - m_new)                       # == 0 on the first step
    p = jnp.exp(e - m_new)                               # [tq, tk]
    l_sc[...] = corr * l_sc[...] + jnp.sum(p, axis=1, keepdims=True)

    if h_resident:
        # Whole projected feature matrix is VMEM-resident; slice this step's
        # neighbor tile out of it (no per-row-tile HBM re-read).
        row0 = pl.multiple_of(j * tk, tk)
        hj = h_ref[pl.ds(row0, tk), :]
    else:
        hj = h_ref[...]                                  # streamed [tk, F] tile
    acc_sc[...] = corr * acc_sc[...] + jnp.dot(
        p.astype(hj.dtype), hj, preferred_element_type=jnp.float32)
    m_sc[...] = m_new

    # TODO(synk): F.dropout on the attention weights is training-mode only;
    # forward implemented in eval mode (identity).
    # TODO(synk): for sparse graphs, prefetch a per-(i,j)-tile "has edges"
    # bitmap via PrefetchScalarGridSpec and pl.when-skip fully masked tiles.

    @pl.when(j == pl.num_programs(1) - 1)
    def _():
        # EUP reciprocal (separate VLIW slot) instead of a VPU divide sequence.
        inv_l = pl.reciprocal(l_sc[...], approx=True)
        h_prime = acc_sc[...] * inv_l
        if concat:
            # ELU negative branch: exp(x) - 1 (== expm1 to ~1e-7 abs here).
            h_prime = jnp.where(h_prime > 0, h_prime, jnp.exp(h_prime) - 1.0)
        out_ref[...] = h_prime.astype(out_ref.dtype)


# ---------------------------------------------------------------------------
# Wrapper
# ---------------------------------------------------------------------------
def gat_forward(x, W, a, adj, *, alpha=0.2, concat=True,
                h_dtype=jnp.bfloat16, tq=None, tk=None):
    """GAT forward.  h is stored in `h_dtype` (bf16 default: full-rate MXU and
    half the h HBM traffic; softmax logits/statistics are always f32).  Pass
    h_dtype=jnp.float32 for a tight-tolerance path.  tq/tk override the
    attention tiles (testing / tuning)."""
    N, f_in = x.shape
    f_out = W.shape[1]
    f32 = jnp.float32
    h_bytes = jnp.dtype(h_dtype).itemsize

    f_out_p = _round_up(f_out, 128)

    # ---- attention tile selection -------------------------------------------
    TQ, TK = 512, 1024
    if (tq is None) != (tk is None):
        raise ValueError("pass both tq and tk or neither")
    if tq is not None:
        assert tq % 32 == 0 and tk % tq == 0 and tk % 128 == 0
        n_pad = _round_up(N, tk)
    elif N >= TK:
        n_pad = _round_up(N, TK)            # TK is a multiple of TQ
        tq, tk = TQ, TK
    elif N > 128:
        # Single neighbor tile, but >= 2 row tiles so the "parallel" row axis
        # can split across both v7x TensorCores.  tq multiple of 32 keeps the
        # int8 adjacency block layout-friendly.
        n_pad = _round_up(N, 64)
        tq, tk = n_pad // 2, n_pad
    else:
        n_pad = _round_up(N, 8)             # tiny: single tile each way
        tq = tk = n_pad
    n_row_tiles = n_pad // tq
    n_col_tiles = n_pad // tk

    # Zero padding is exact: padded adjacency entries are 0 (masked to -9e15,
    # weight underflows to exactly 0), padded h rows are 0, padded output
    # rows/cols are sliced away.
    x_p = jnp.zeros((n_pad, f_in), f32).at[:N, :].set(x.astype(f32))
    w_p = jnp.zeros((f_in, f_out_p), f32).at[:, :f_out].set(W.astype(f32))
    a1 = jnp.zeros((1, f_out_p), f32).at[0, :f_out].set(a[:f_out, 0].astype(f32))
    a2 = jnp.zeros((1, f_out_p), f32).at[0, :f_out].set(a[f_out:, 0].astype(f32))
    # adj is the only O(N^2) HBM stream: ship it as int8 (4x less kernel DMA
    # than f32) and fold the pad into the same single conversion pass.
    # TODO(synk): for huge graphs accept a caller-provided pre-packed int8 adj
    # (or pass adj unpadded + iota-mask the ragged tail) to drop this one-time
    # O(N^2) conversion pass too.
    adj_p = jnp.zeros((n_pad, n_pad), jnp.int8).at[:N, :N].set(
        (adj > 0).astype(jnp.int8))

    # ---- Kernel 1: projection (DMA/overhead bound; large row blocks) --------
    per_row = 2 * (4 * f_in + h_bytes * f_out_p + 8)     # dbl-buffered in+outs
    if n_pad * per_row <= 12 * 1024 * 1024:
        rows1 = n_pad
    else:
        rows1 = 16
        for cand in (4096, 2048, 1024, 512, 256, 128, 64, 32, 16):
            if n_pad % cand == 0 and cand * per_row <= 12 * 1024 * 1024:
                rows1 = cand
                break

    proj_cost = pl.CostEstimate(
        flops=2 * n_pad * f_in * f_out_p + 4 * n_pad * f_out_p,
        transcendentals=0,
        bytes_accessed=(4 * n_pad * f_in + 4 * f_in * f_out_p
                        + h_bytes * n_pad * f_out_p + 8 * n_pad),
    )
    h, f1, f2 = pl.pallas_call(
        _gat_project_kernel,
        out_shape=(
            jax.ShapeDtypeStruct((n_pad, f_out_p), h_dtype),
            jax.ShapeDtypeStruct((n_pad, 1), f32),
            jax.ShapeDtypeStruct((n_pad, 1), f32),
        ),
        grid_spec=pltpu.PrefetchScalarGridSpec(
            num_scalar_prefetch=0,
            grid=(n_pad // rows1,),
            in_specs=[
                pl.BlockSpec((rows1, f_in), lambda i: (i, 0)),
                pl.BlockSpec((f_in, f_out_p), lambda i: (0, 0)),
                pl.BlockSpec((1, f_out_p), lambda i: (0, 0)),
                pl.BlockSpec((1, f_out_p), lambda i: (0, 0)),
            ],
            out_specs=(
                pl.BlockSpec((rows1, f_out_p), lambda i: (i, 0)),
                pl.BlockSpec((rows1, 1), lambda i: (i, 0)),
                pl.BlockSpec((rows1, 1), lambda i: (i, 0)),
            ),
        ),
        compiler_params=pltpu.CompilerParams(
            dimension_semantics=("parallel",),
            vmem_limit_bytes=32 * 1024 * 1024),
        cost_estimate=proj_cost,
    )(x_p, w_p, a1, a2)

    # f2 as a lane-major [1, n_pad] row so the attention kernel broadcasts it
    # along lanes with no per-tile transpose (n_pad*4-byte relayout; kept in
    # the wrapper rather than forcing a sublane->lane transpose in kernel 1).
    f2_row = f2.reshape(1, n_pad)

    # ---- Kernel 2: tiled online-softmax attention ----------------------------
    # Keep all of h VMEM-resident across the whole sweep when it fits: one HBM
    # read instead of one per row tile.  Threshold leaves room for the
    # pipeline's double-buffering + intermediates on every generation
    # (v5e/v6e 128 MiB, v7x 64 MiB physical VMEM).
    h_resident = (n_pad * f_out_p * h_bytes) <= 6 * 1024 * 1024
    if h_resident:
        h_spec = pl.BlockSpec((n_pad, f_out_p), lambda i, j: (0, 0))
    else:
        # TODO(synk): for graphs too large for residency, consider
        # pipeline_mode=pl.Buffered(3) on adj/h if the trace shows exposed DMA.
        h_spec = pl.BlockSpec((tk, f_out_p), lambda i, j: (j, 0))

    kernel = functools.partial(
        _gat_attention_kernel, alpha=float(alpha), concat=bool(concat),
        tk=tk, h_resident=h_resident)
    attn_cost = pl.CostEstimate(
        flops=2 * n_pad * n_pad * f_out_p + 8 * n_pad * n_pad,
        transcendentals=n_pad * n_pad,
        bytes_accessed=(n_pad * n_pad                                   # int8 adj
                        + (1 if h_resident else n_row_tiles) * n_pad * f_out_p * h_bytes
                        + 4 * n_pad * f_out_p + 12 * n_pad),
    )
    out = pl.pallas_call(
        kernel,
        out_shape=jax.ShapeDtypeStruct((n_pad, f_out_p), f32),
        grid_spec=pltpu.PrefetchScalarGridSpec(
            num_scalar_prefetch=0,
            grid=(n_row_tiles, n_col_tiles),
            in_specs=[
                pl.BlockSpec((tq, 1), lambda i, j: (i, 0)),      # f1 rows
                pl.BlockSpec((1, tk), lambda i, j: (0, j)),      # f2 cols
                pl.BlockSpec((tq, tk), lambda i, j: (i, j)),     # adj tile (int8)
                h_spec,                                          # h (resident or streamed)
            ],
            out_specs=pl.BlockSpec((tq, f_out_p), lambda i, j: (i, 0)),
            scratch_shapes=[
                pltpu.VMEM((tq, 1), f32),         # running max
                pltpu.VMEM((tq, 1), f32),         # running denominator
                pltpu.VMEM((tq, f_out_p), f32),   # output accumulator
            ],
        ),
        compiler_params=pltpu.CompilerParams(
            dimension_semantics=("parallel", "arbitrary"),
            vmem_limit_bytes=48 * 1024 * 1024),
        cost_estimate=attn_cost,
    )(f1, f2_row, adj_p, h)

    return out[:N, :f_out]


# ---------------------------------------------------------------------------
# Pure-JAX reference mirroring the PyTorch forward exactly (eval mode).
# ---------------------------------------------------------------------------
def gat_reference(x, W, a, adj, *, alpha=0.2, concat=True):
    h = x @ W
    N = h.shape[0]
    f_out = W.shape[1]
    a_input = jnp.concatenate(
        [jnp.tile(h, (1, N)).reshape(N * N, -1), jnp.tile(h, (N, 1))], axis=1
    ).reshape(N, -1, 2 * f_out)
    e = (a_input @ a).squeeze(2)
    e = jnp.where(e > 0, e, alpha * e)
    attention = jnp.where(adj > 0, e, -9e15)
    attention = jax.nn.softmax(attention, axis=1)
    h_prime = attention @ h
    if concat:
        h_prime = jax.nn.elu(h_prime)
    return h_prime


def _xavier_uniform(key, shape, gain):
    fan_in, fan_out = shape
    bound = gain * (6.0 / (fan_in + fan_out)) ** 0.5
    return jax.random.uniform(key, shape, jnp.float32, -bound, bound)


def _make_case(key, N, f_in, f_out):
    k_x, k_w, k_a, k_adj = jax.random.split(key, 4)
    x = jax.random.normal(k_x, (N, f_in), jnp.float32)
    W = _xavier_uniform(k_w, (f_in, f_out), 1.414)
    a = _xavier_uniform(k_a, (2 * f_out, 1), 1.414)
    adj = (jax.random.uniform(k_adj, (N, N)) > 0.5).astype(jnp.float32)
    adj = jnp.maximum(adj, jnp.eye(N, dtype=jnp.float32))  # self loops
    return x, W, a, adj


if __name__ == "__main__":
    alpha, concat = 0.2, True  # dropout=0.6 unused (eval mode)
    key = jax.random.PRNGKey(0)
    k1, k2 = jax.random.split(key)

    # Case 1: tiny single-tile path (N=8 nodes, 16 -> 32 features).
    x, W, a, adj = _make_case(k1, 8, 16, 32)
    ref = gat_reference(x, W, a, adj, alpha=alpha, concat=concat)
    out = jax.block_until_ready(gat_forward(x, W, a, adj, alpha=alpha, concat=concat))
    assert out.shape == ref.shape
    assert jnp.allclose(out, ref, atol=3e-2, rtol=3e-2), \
        f"case1 bf16 mismatch: {float(jnp.max(jnp.abs(out - ref)))}"
    out32 = jax.block_until_ready(
        gat_forward(x, W, a, adj, alpha=alpha, concat=concat, h_dtype=jnp.float32))
    assert jnp.allclose(out32, ref, atol=2e-3, rtol=2e-3), \
        f"case1 f32 mismatch: {float(jnp.max(jnp.abs(out32 - ref)))}"

    # Case 2: mid-size path (>=2 row tiles for megacore, VMEM-resident h), bf16.
    x, W, a, adj = _make_case(k2, 520, 16, 32)
    ref = gat_reference(x, W, a, adj, alpha=alpha, concat=concat)
    out = jax.block_until_ready(gat_forward(x, W, a, adj, alpha=alpha, concat=concat))
    assert jnp.allclose(out, ref, atol=3e-2, rtol=3e-2), \
        f"case2 bf16 mismatch: {float(jnp.max(jnp.abs(out - ref)))}"

    # Case 3: same data, small explicit tiles to exercise the multi-neighbor-
    # tile online-softmax path (grid 6 x 3) and resident-h slicing, f32.
    out32 = jax.block_until_ready(
        gat_forward(x, W, a, adj, alpha=alpha, concat=concat,
                    h_dtype=jnp.float32, tq=128, tk=256))
    assert jnp.allclose(out32, ref, atol=2e-3, rtol=2e-3), \
        f"case3 f32 mismatch: {float(jnp.max(jnp.abs(out32 - ref)))}"

    print("KERNEL_OK")
</pallas_src>

<mosaic_0001>
module attributes {stable_mosaic.version = 11 : i64} {
  func.func @_gat_project_kernel(%arg0: i32, %arg1: memref<8x16xf32, #tpu.memory_space<vmem>>, %arg2: memref<16x128xf32, #tpu.memory_space<vmem>>, %arg3: memref<1x128xf32, #tpu.memory_space<vmem>>, %arg4: memref<1x128xf32, #tpu.memory_space<vmem>>, %arg5: memref<8x128xbf16, #tpu.memory_space<vmem>>, %arg6: memref<8x1xf32, #tpu.memory_space<vmem>>, %arg7: memref<8x1xf32, #tpu.memory_space<vmem>>) attributes {dimension_semantics = [#tpu.dimension_semantics<parallel>], iteration_bounds = array<i64: 1>, scalar_prefetch = 0 : i64, scratch_operands = 0 : i64, tpu.core_type = #tpu.core_type<tc>, window_params = [{transform_indices = @transform_0, window_bounds = array<i64: 8, 16>}, {pipeline_mode = #tpu.pipeline_mode<synchronous>, transform_indices = @transform_1, window_bounds = array<i64: 16, 128>}, {pipeline_mode = #tpu.pipeline_mode<synchronous>, transform_indices = @transform_2, window_bounds = array<i64: 1, 128>}, {pipeline_mode = #tpu.pipeline_mode<synchronous>, transform_indices = @transform_3, window_bounds = array<i64: 1, 128>}, {transform_indices = @transform_4, window_bounds = array<i64: 8, 128>}, {transform_indices = @transform_5, window_bounds = array<i64: 8, 1>}, {transform_indices = @transform_6, window_bounds = array<i64: 8, 1>}]} {
    %c0 = arith.constant 0 : index
    %c0_0 = arith.constant 0 : index
    %0 = vector.load %arg1[%c0, %c0_0] : memref<8x16xf32, #tpu.memory_space<vmem>>, vector<8x16xf32>
    %c0_1 = arith.constant 0 : index
    %c0_2 = arith.constant 0 : index
    %1 = vector.load %arg2[%c0_1, %c0_2] : memref<16x128xf32, #tpu.memory_space<vmem>>, vector<16x128xf32>
    %cst = arith.constant dense<0.000000e+00> : vector<8x128xf32>
    %2 = tpu.matmul %0, %1, %cst {dimension_numbers = #tpu.dot_dimension_numbers<[1], [0], [0], [1], [0, 0, 1, 1], [], []>} : vector<8x16xf32>, vector<16x128xf32>, vector<8x128xf32> -> vector<8x128xf32>
    %c0_3 = arith.constant 0 : index
    %c0_4 = arith.constant 0 : index
    %3 = vector.load %arg3[%c0_3, %c0_4] : memref<1x128xf32, #tpu.memory_space<vmem>>, vector<1x128xf32>
    %4 = vector.broadcast %3 : vector<1x128xf32> to vector<8x128xf32>
    %5 = arith.mulf %2, %4 : vector<8x128xf32>
    %cst_5 = arith.constant dense<0.000000e+00> : vector<8xf32>
    %6 = vector.multi_reduction <add>, %5, %cst_5 [1] : vector<8x128xf32> to vector<8xf32>
    %7 = vector.shape_cast %6 : vector<8xf32> to vector<8x1xf32>
    %c0_6 = arith.constant 0 : index
    %c0_7 = arith.constant 0 : index
    %8 = vector.load %arg6[%c0_6, %c0_7] : memref<8x1xf32, #tpu.memory_space<vmem>>, vector<8x1xf32>
    tpu.vector_store %arg6[%c0_6, %c0_7], %7 {strides = array<i32>} : memref<8x1xf32, #tpu.memory_space<vmem>>, vector<8x1xf32>,
    %c0_8 = arith.constant 0 : index
    %c0_9 = arith.constant 0 : index
    %9 = vector.load %arg4[%c0_8, %c0_9] : memref<1x128xf32, #tpu.memory_space<vmem>>, vector<1x128xf32>
    %10 = vector.broadcast %9 : vector<1x128xf32> to vector<8x128xf32>
    %11 = arith.mulf %2, %10 : vector<8x128xf32>
    %cst_10 = arith.constant dense<0.000000e+00> : vector<8xf32>
    %12 = vector.multi_reduction <add>, %11, %cst_10 [1] : vector<8x128xf32> to vector<8xf32>
    %13 = vector.shape_cast %12 : vector<8xf32> to vector<8x1xf32>
    %c0_11 = arith.constant 0 : index
    %c0_12 = arith.constant 0 : index
    %14 = vector.load %arg7[%c0_11, %c0_12] : memref<8x1xf32, #tpu.memory_space<vmem>>, vector<8x1xf32>
    tpu.vector_store %arg7[%c0_11, %c0_12], %13 {strides = array<i32>} : memref<8x1xf32, #tpu.memory_space<vmem>>, vector<8x1xf32>,
    %15 = arith.truncf %2 : vector<8x128xf32> to vector<8x128xbf16>
    %c0_13 = arith.constant 0 : index
    %c0_14 = arith.constant 0 : index
    %16 = vector.load %arg5[%c0_13, %c0_14] : memref<8x128xbf16, #tpu.memory_space<vmem>>, vector<8x128xbf16>
    tpu.vector_store %arg5[%c0_13, %c0_14], %15 {strides = array<i32>} : memref<8x128xbf16, #tpu.memory_space<vmem>>, vector<8x128xbf16>,
    return
  }
  func.func @transform_0(%arg0: i32) -> (i32, i32) {
    %c0_i32 = arith.constant 0 : i32
    %c0_i32_0 = arith.constant 0 : i32
    return %arg0, %c0_i32 : i32, i32
  }
  func.func @transform_1(%arg0: i32) -> (i32, i32) {
    %c0_i32 = arith.constant 0 : i32
    %c0_i32_0 = arith.constant 0 : i32
    %c0_i32_1 = arith.constant 0 : i32
    return %c0_i32, %c0_i32_0 : i32, i32
  }
  func.func @transform_2(%arg0: i32) -> (i32, i32) {
    %c0_i32 = arith.constant 0 : i32
    %c0_i32_0 = arith.constant 0 : i32
    %c0_i32_1 = arith.constant 0 : i32
    return %c0_i32, %c0_i32_0 : i32, i32
  }
  func.func @transform_3(%arg0: i32) -> (i32, i32) {
    %c0_i32 = arith.constant 0 : i32
    %c0_i32_0 = arith.constant 0 : i32
    %c0_i32_1 = arith.constant 0 : i32
    return %c0_i32, %c0_i32_0 : i32, i32
  }
  func.func @transform_4(%arg0: i32) -> (i32, i32) {
    %c0_i32 = arith.constant 0 : i32
    %c0_i32_0 = arith.constant 0 : i32
    return %arg0, %c0_i32 : i32, i32
  }
  func.func @transform_5(%arg0: i32) -> (i32, i32) {
    %c0_i32 = arith.constant 0 : i32
    %c0_i32_0 = arith.constant 0 : i32
    return %arg0, %c0_i32 : i32, i32
  }
  func.func @transform_6(%arg0: i32) -> (i32, i32) {
    %c0_i32 = arith.constant 0 : i32
    %c0_i32_0 = arith.constant 0 : i32
    return %arg0, %c0_i32 : i32, i32
  }
}

</mosaic_0001>

<bundles_post_ra>
// kernel: tpu_custom_call.1
= control target key start
LH: loop header
LB: loop body
LE: loop exit
PB: predicated region body
PF: predicated region fallthrough
CT: control target
= control target key end

     0   :  { %12 = vsyncpa [#allocation3], 0  ;;  %s367_s0 = inlined_call_operand.hbm [shape: f32[8,16], index: 0, kind: input, shape index: {}]   ;;  %s368_s1 = inlined_call_operand.hbm [shape: f32[16,128], index: 1, kind: input, shape index: {}]   ;;  %s369_s2 = inlined_call_operand.vmem [shape: f32[1,128], index: 2, kind: input, shape index: {}]   ;;  %s370_s3 = inlined_call_operand.vmem [shape: f32[1,128], index: 3, kind: input, shape index: {}]   ;;  %s371_s4 = inlined_call_operand.hbm [shape: bf16[8,128], index: 4, kind: output, shape index: {0}]   ;;  %s372_s5 = inlined_call_operand.vmem [shape: f32[8,1], index: 5, kind: output, shape index: {1}]   ;;  %s373_s6 = inlined_call_operand.vmem [shape: f32[8,1], index: 6, kind: output, shape index: {2}]  }
   0x1   :  { %13 = vsyncpa [#allocation6], 0 }
   0x2   :  { %14 = vsyncpa [#allocation4], 0  ;;  %s269_s21 = smov [#allocation2]   ;;  %s270_s23 = smov [#allocation5]  }
   0x3   :  { %s21_s22 = sshll.u32 %s269_s21, 4  ;;  %s30_s24 = sshll.u32 %s270_s23, 4  ;;  %s22_s22 = int_to_ptr.vmem [resolvable:$true] %s21_s22  ;;  %s312_s24 = int_to_ptr.vmem [resolvable:$true] %s30_s24 }
   0x4   :  { %s197_s27 = scalar_lea.hbm %s367_s0, 128 }
   0x5   :  { %p198_p0 = scmp.ne.s32.totalorder %s367_s0, %s197_s27  ;;  %p201_p1 = scmp.lt.u32.totalorder %s197_s27, %s367_s0 }
   0x7   :  { %p203_p2 = pnand %p201_p1, %p198_p0 }
   0x9   :  { %206 = shalt.err (!%p203_p2)
}
   0xa   :  { %s207_s8 = scalar_lea.vmem %s22_s22, 128  ;;  %p212_p4 = scmp.lt.s32.totalorder %s22_s22, %s22_s22 }
   0xb   :  { %p208_p3 = scmp.ne.s32.totalorder %s22_s22, %s207_s8  ;;  %p213_p5 = scmp.lt.s32.totalorder %s207_s8, %s207_s8 }
   0xd   :  { %p214_p6 = por %p213_p5, %p212_p4 }
   0xf   :  { %p215_p7 = pnand %p214_p6, %p208_p3 }
  0x11   :  { %218 = shalt.err (!%p215_p7)
}
  0x12   :  { %24 = dma.hbm_to_vmem [thread:$0]  %s367_s0, 128, %s22_s22, [#allocation3]  }
  0x13   :  { %s219_s13 = scalar_lea.hbm %s368_s1, 256 }
  0x14   :  { %p220_p8 = scmp.ne.s32.totalorder %s368_s1, %s219_s13  ;;  %p223_p9 = scmp.lt.u32.totalorder %s219_s13, %s368_s1 }
  0x16   :  { %p225_p10 = pnand %p223_p9, %p220_p8 }
  0x18   :  { %228 = shalt.err (!%p225_p10)
}
  0x19   :  { %s229_s18 = scalar_lea.vmem %s312_s24, 256  ;;  %p234_p12 = scmp.lt.s32.totalorder %s312_s24, %s312_s24 }
  0x1a   :  { %p230_p11 = scmp.ne.s32.totalorder %s312_s24, %s229_s18  ;;  %p235_p13 = scmp.lt.s32.totalorder %s229_s18, %s229_s18 }
  0x1c   :  { %p236_p0 = por %p235_p13, %p234_p12 }
  0x1e   :  { %p237_p1 = pnand %p236_p0, %p230_p11 }
  0x20   :  { %240 = shalt.err (!%p237_p1)
}
  0x21   :  { %s271_s0 = smov 128   ;;  %s272_s19 = smov 8  }
  0x22   :  { %36 = dma.hbm_to_vmem [thread:$0]  %s368_s1, 256, %s312_s24, [#allocation6], %s271_s0, %s271_s0, %s272_s19  }
  0x23   :  { %263 = dma.done.wait [#allocation3], 128  }
  0x24   :  { %264 = vsyncadd [#allocation3], 4294967168 }
  0x25   :  { %265 = dma.done.wait [#allocation6], 256  }
  0x26   :  { %266 = vsyncadd [#allocation6], 4294967040  ;;  %v273_v0 = vmov 0.0|0.0   ;;  %vm274_vm0 = vmmov 0   ;;  %v275_v1 = vmov 0.0   ;;  %v48_v2 = vld [vmem:[#allocation5] sm:$0xff] }
  0x27   :  { %186 = vmatprep.subr.bf16.mxu0 %v273_v0  ;;  %183 = vmatprep.mubr.msk.f32.mxu0 %vm274_vm0, %v275_v1  ;;  %v49_v3 = vld [vmem:[#allocation5 + $0x8] sm:$0xff]  ;;  %v47_v5 = vld [vmem:[#allocation2] sm:$0xff]  ;;  %vm50_vm1 = vcmask 130048   ;;  %s276_s25 = smov [#allocation7]  }
  0x28   :  { %v187_v4 = vpack.c.bf16 %v49_v3, %v48_v2  ;;  %v174_v6 = vld [vmem:[%s369_s2] ss:$0 sm:$0xff]  ;;  %s155_s26 = sshll.u32 %s276_s25, 4  ;;  %s156_s26 = int_to_ptr.vmem [resolvable:$true] %s155_s26 }
  0x29   :  { %v175_v11 = vld [vmem:[%s370_s3] ss:$0 sm:$0xff]  ;;  %s241_s27 = scalar_lea.vmem %s156_s26, 64  ;;  %p246_p3 = scmp.lt.s32.totalorder %s156_s26, %s156_s26 }
  0x2a   :  { %188 = vmatpush3.bf16.msra.mxu0 %v187_v4  ;;  %p242_p2 = scmp.ne.s32.totalorder %s156_s26, %s241_s27  ;;  %p247_p4 = scmp.lt.s32.totalorder %s241_s27, %s241_s27 }
  0x2c   :  { %p248_p5 = por %p247_p4, %p246_p3 }
  0x2d   :  { %184 = vmatmul.mubr.msk.f32.vlgmr.msra.gmra.mrb[0].mxu0 %vm50_vm1, %v47_v5 }
  0x2e   :  { %p249_p6 = pnand %p248_p5, %p242_p2 }
 0x100   :  { %v120_v7 = vpop.f32.mrb[0].mxu0 }
 0x101   :  { %v147_v8 = vpack.c.bf16 %v120_v7, %v120_v7  ;;  %v185_v9 = vpop.f32.mrb[1].mxu0  ;;  %v131_v10 = vmul.f32 %v174_v6, %v120_v7  ;;  %v143_v12 = vmul.f32 %v175_v11, %v120_v7 }
 0x103   :  { %148 = vst [vmem:[#allocation7] sm:$0xf] %v147_v8  ;;  %132 = vadd.xlane.f32.xlu0 %v131_v10 }
 0x107   :  { %144 = vadd.xlane.f32.xlu0 %v143_v12 }
 0x108   :  { %252 = shalt.err (!%p249_p6)
}
 0x109   :  { %s253_s29 = scalar_lea.hbm %s371_s4, 64 }
 0x10a   :  { %p254_p7 = scmp.ne.s32.totalorder %s371_s4, %s253_s29  ;;  %p257_p8 = scmp.lt.u32.totalorder %s253_s29, %s371_s4 }
 0x10c   :  { %p259_p9 = pnand %p257_p8, %p254_p7 }
 0x10e   :  { %262 = shalt.err (!%p259_p9)
}
 0x10f   :  { %158 = dma.vmem_to_hbm [thread:$0]  %s156_s26, 64, %s371_s4, [#allocation4]   ;;  %vm134_vm2 = vcmask 7168  }
 0x190   :  { %v133_v13 = vpop.xlane.xlu0 %132 }
 0x191   :  { %135 = vst.msk [vmem:[%s372_s5] sm:$0xff] %vm134_vm2, %v133_v13 }
 0x194   :  { %v145_v14 = vpop.xlane.xlu0 %144 }
 0x195   :  { %146 = vst.msk [vmem:[%s373_s6] sm:$0xff] %vm134_vm2, %v145_v14 }
 0x196   :  { %267 = dma.done.wait [#allocation4], 64  }
 0x197   :  { %268 = vsyncadd [#allocation4], 4294967232 }
 0x198   :  { %170 = vsyncpa [#allocation3], 1 }
 0x199   :  { %171 = vsyncpa [#allocation6], 1 }
 0x19a   :  { %172 = vsyncpa [#allocation4], 1 }

</bundles_post_ra>
